<compile_context>
chip_gen: v7x
topology: tpu7x:2x2x1
jax: 0.10.0
libtpu: 0.0.40
codegen_flags: <defaults>
</compile_context>

<pallas_src>
import jax
import jax.numpy as jnp
from jax.experimental import pallas as pl
from jax.experimental.pallas import tpu as pltpu


def _round_up(x, m):
    return ((x + m - 1) // m) * m


# --------------------------------------------------------------------------- kernels
def _layer_norm_store(z, g_ref, beta_ref, o_ref, eps=1e-5):
    """Row-wise LayerNorm of f32 `z` into o_ref.  One-pass mean/variance
    (E[z^2] - E[z]^2) halves the cross-lane (XLU) reduction work."""
    d_inv = 1.0 / z.shape[-1]
    mean = jnp.sum(z, axis=-1, keepdims=True) * d_inv
    mean_sq = jnp.sum(z * z, axis=-1, keepdims=True) * d_inv
    var = jnp.maximum(mean_sq - mean * mean, 0.0)
    zn = (z - mean) * jax.lax.rsqrt(var + eps)
    o_ref[...] = (zn * g_ref[...] + beta_ref[...]).astype(o_ref.dtype)


def ffn_kernel_resident(x_ref, w1_ref, b1_ref, w2_ref, b2_ref, g_ref, beta_ref, o_ref):
    """Weight-resident fast path (hidden dim not tiled, n_k == 1): no accumulator
    scratch, no init/finalize pl.when phases; straight through to the output tile."""
    x = x_ref[...]
    x_bf = x.astype(jnp.bfloat16)
    h = jnp.dot(x_bf, w1_ref[...], preferred_element_type=jnp.float32)      # (TM, H)
    h = jnp.maximum(h + b1_ref[...], 0.0)                                   # ReLU in f32
    y = jnp.dot(h.astype(jnp.bfloat16), w2_ref[...],
                preferred_element_type=jnp.float32)                         # (TM, D)
    # TODO(synk): nn.Dropout is identity in eval mode; training-mode dropout
    # (pltpu.prng_random_bits mask) is not implemented here.
    z = x.astype(jnp.float32) + y + b2_ref[...]                             # residual
    _layer_norm_store(z, g_ref, beta_ref, o_ref)


def ffn_kernel_tiled(x_ref, w1_ref, b1_ref, w2_ref, b2_ref, g_ref, beta_ref, o_ref,
                     acc_ref, xbf_ref):
    """Hidden-dim streamed path (n_k > 1): f32 accumulator over hidden tiles;
    x is cast to bf16 once per row tile (k == 0), not once per k step."""
    k = pl.program_id(1)

    @pl.when(k == 0)
    def _init():
        acc_ref[...] = jnp.zeros_like(acc_ref)
        xbf_ref[...] = x_ref[...].astype(jnp.bfloat16)

    h = jnp.dot(xbf_ref[...], w1_ref[...], preferred_element_type=jnp.float32)   # (TM, TK)
    h = jnp.maximum(h + b1_ref[...], 0.0)
    acc_ref[...] += jnp.dot(h.astype(jnp.bfloat16), w2_ref[...],
                            preferred_element_type=jnp.float32)                  # (TM, D)

    @pl.when(k == pl.num_programs(1) - 1)
    def _finalize():
        # TODO(synk): dropout identity (eval mode only), same as resident path.
        z = x_ref[...].astype(jnp.float32) + acc_ref[...] + b2_ref[...]
        _layer_norm_store(z, g_ref, beta_ref, o_ref)


# --------------------------------------------------------------------------- planning
def _tpu_topology():
    """(VMEM bytes per TensorCore, TensorCores per chip); conservative defaults
    (v7x-sized 64 MiB VMEM, 1 core) if the query is unavailable."""
    vmem, cores = 64 * 1024 * 1024, 1
    try:
        info = pltpu.get_tpu_info()
        for name in ("vmem_capacity_bytes", "vmem_bytes", "vmem_size_bytes"):
            v = getattr(info, name, None)
            if v:
                vmem = int(v)
                break
        for name in ("num_cores", "core_count", "tensorcore_count", "num_tensorcores"):
            c = getattr(info, name, None)
            if c:
                cores = int(c)
                break
    except Exception:
        pass
    return vmem, cores


def _fits_resident(tm, D, H, budget):
    # x + out tiles (f32, double-buffered) + resident bf16 W1/W2 (2 buffers each)
    # + f32 hidden activation + its bf16 MXU copy + small params.
    return 16 * tm * D + 8 * D * H + 6 * tm * H + 4 * (H + 3 * D) <= budget


def _fits_streamed(tm, tk, D, H, budget):
    # Adds the f32 accumulator + bf16 x-copy scratch; weights tiled to tk.
    return 22 * tm * D + 8 * D * tk + 6 * tm * tk + 4 * (H + 3 * D) <= budget


def _pick_tk(H, D, tm, budget):
    """Largest hidden tile that (a) divides H, (b) is 256-aligned (v6e/v7x MXU
    contraction/output width), falling back to 128 (v5e-native), and (c) keeps
    the streamed-schedule VMEM footprint within `budget`."""
    for align in (256, 128):
        if H % align:
            continue
        tk = (H // align) * align
        while tk >= align:
            if H % tk == 0 and _fits_streamed(tm, tk, D, H, budget):
                return tk
            tk -= align
    # Nothing fits cleanly: smallest lane-aligned divisor keeps compiling even
    # if it overshoots the soft budget.
    for align in (128, 256):
        if H % align == 0:
            return align
    return H  # TODO(synk): H has no multiple-of-128 divisor; single full-H tile.


def prepare_ffn_params(w1, b1, w2, b2, gamma, beta):
    """One-time parameter prep: bf16 MXU weights (so the per-call wrapper never
    re-reads / re-casts the f32 weights from HBM), f32 biases / LayerNorm params."""
    return (w1.astype(jnp.bfloat16), jnp.asarray(b1, jnp.float32),
            w2.astype(jnp.bfloat16), jnp.asarray(b2, jnp.float32),
            jnp.asarray(gamma, jnp.float32), jnp.asarray(beta, jnp.float32))


# --------------------------------------------------------------------------- wrapper
def feed_forward_network(x, w1, b1, w2, b2, gamma, beta, *,
                         tm=None, tk=None, vmem_limit_bytes=None, out_dtype=None):
    """x: (B, S, D); w1: (D, 4D); w2: (4D, D). Returns (B, S, D) in `out_dtype`
    (default x.dtype; pass jnp.bfloat16 to halve output HBM writeback)."""
    B, S, D = x.shape
    H = w1.shape[1]
    N = B * S
    out_dtype = x.dtype if out_dtype is None else out_dtype

    vmem_cap, num_cores = _tpu_topology()
    if vmem_limit_bytes is None:
        # ~96 MiB on v5e/v6e (128 MiB VMEM), ~48 MiB on v7x (64 MiB per TC).
        vmem_limit_bytes = (vmem_cap * 3) // 4
    budget = vmem_limit_bytes - (2 << 20)       # headroom for compiler scratch

    # ---------------- schedule selection ----------------
    tm_req = 256 if tm is None else tm
    tm_eff = max(8, _round_up(min(tm_req, _round_up(N, 8)), 8))

    # Prefer the weight-resident schedule (tk == H): W1/W2 are DMA'd once and
    # reused by every row tile (no re-streaming) and the kernel needs no
    # accumulator.  Shrink the row tile if that's what it takes to fit.
    resident = False
    tk_eff = H
    if tk is None or tk >= H:
        t = tm_eff
        while t > 8 and not _fits_resident(t, D, H, budget):
            t = max(8, ((t // 2) // 8) * 8)
        if _fits_resident(t, D, H, budget):
            resident, tm_eff, tk_eff = True, t, H

    if not resident:
        # Streamed schedule: weights re-fetched for every row tile, so go for
        # big row tiles (arithmetic intensity ~= tm flops / weight byte; v6e
        # roofline knee ~650) and 256-aligned tk for the 256x256 MXUs.
        if tm is None:
            tm_eff = max(8, _round_up(min(768, _round_up(N, 8)), 8))
        if tk is not None:
            tk_eff = min(tk, H)
        else:
            tk_eff = _pick_tk(H, D, tm_eff, budget)
        assert H % tk_eff == 0, "hidden dim must be divisible by the hidden tile"

    n_k = H // tk_eff
    n_row_tiles = pl.cdiv(N, tm_eff)
    # v7x has 2 TensorCores per chip: keep the "parallel" row axis divisible by
    # the core count so both cores get row tiles (no-op on v5e/v6e: 1 TC).
    if num_cores > 1 and n_row_tiles > 1 and (n_row_tiles % num_cores):
        n_row_tiles = _round_up(n_row_tiles, num_cores)
        tm_eff = max(8, _round_up(pl.cdiv(N, n_row_tiles), 8))
        n_row_tiles = pl.cdiv(N, tm_eff)
    N_pad = n_row_tiles * tm_eff

    # ---------------- operands ----------------
    x2 = x.reshape(N, D)
    if N_pad != N:
        x2 = jnp.pad(x2, ((0, N_pad - N), (0, 0)))

    # bf16 MXU weights: no-op if params were already prepared via
    # prepare_ffn_params (so no per-call f32 weight re-read / re-cast).
    w1_bf = w1 if w1.dtype == jnp.bfloat16 else w1.astype(jnp.bfloat16)
    w2_bf = w2 if w2.dtype == jnp.bfloat16 else w2.astype(jnp.bfloat16)
    b1_2d = jnp.asarray(b1, jnp.float32).reshape(1, H)
    b2_2d = jnp.asarray(b2, jnp.float32).reshape(1, D)
    g_2d = jnp.asarray(gamma, jnp.float32).reshape(1, D)
    be_2d = jnp.asarray(beta, jnp.float32).reshape(1, D)

    # Weights are re-streamed once per row tile whenever the hidden dim is tiled.
    weight_passes = 1 if n_k == 1 else n_row_tiles
    out_itemsize = jax.dtypes.canonicalize_dtype(out_dtype).itemsize
    cost = pl.CostEstimate(
        flops=4 * N_pad * D * H,                                   # two matmuls, 2 flops/MAC
        transcendentals=N_pad,                                     # rsqrt per row
        bytes_accessed=(N_pad * D * (4 + out_itemsize)             # x in + out
                        + weight_passes * 2 * D * H * 2            # bf16 W1 + W2 (re-streamed)
                        + (H + 3 * D) * 4),                        # biases, gamma, beta
    )

    if n_k == 1:
        kernel = ffn_kernel_resident
        scratch = []
    else:
        kernel = ffn_kernel_tiled
        scratch = [pltpu.VMEM((tm_eff, D), jnp.float32),           # f32 accumulator
                   pltpu.VMEM((tm_eff, D), jnp.bfloat16)]          # bf16 x, cast once/row tile

    # TODO(synk): pipeline_mode=pl.Buffered(1) on the grid-invariant W1/W2 specs would
    # halve resident-weight VMEM (matters for large D on v7x); kept at default buffering
    # for lowering compatibility.
    out = pl.pallas_call(
        kernel,
        out_shape=jax.ShapeDtypeStruct((N_pad, D), out_dtype),
        grid_spec=pltpu.PrefetchScalarGridSpec(
            num_scalar_prefetch=0,
            grid=(n_row_tiles, n_k),                               # reduction (hidden) axis last
            in_specs=[
                pl.BlockSpec((tm_eff, D), lambda i, k: (i, 0)),    # x row tile (k-invariant)
                pl.BlockSpec((D, tk_eff), lambda i, k: (0, k)),    # W1 hidden tile
                pl.BlockSpec((1, tk_eff), lambda i, k: (0, k)),    # b1 hidden tile
                pl.BlockSpec((tk_eff, D), lambda i, k: (k, 0)),    # W2 hidden tile
                pl.BlockSpec((1, D), lambda i, k: (0, 0)),         # b2
                pl.BlockSpec((1, D), lambda i, k: (0, 0)),         # gamma
                pl.BlockSpec((1, D), lambda i, k: (0, 0)),         # beta
            ],
            out_specs=pl.BlockSpec((tm_eff, D), lambda i, k: (i, 0)),
            scratch_shapes=scratch,
        ),
        compiler_params=pltpu.CompilerParams(
            dimension_semantics=("parallel", "arbitrary"),
            vmem_limit_bytes=int(vmem_limit_bytes),
        ),
        cost_estimate=cost,
    )(x2, w1_bf, b1_2d, w2_bf, b2_2d, g_2d, be_2d)

    return out[:N].reshape(B, S, D)


if __name__ == "__main__":
    # Small shapes consistent with the module; d_model lane-dense (multiple of 128).
    B, S, D = 2, 8, 128
    H = 4 * D

    key = jax.random.PRNGKey(0)
    kx, k1, k2, k3, k4 = jax.random.split(key, 5)

    x = jax.random.normal(kx, (B, S, D), dtype=jnp.float32)
    # PyTorch Linear stores (out, in); we keep (in, out) so the kernel does x @ W.
    w1 = jax.random.normal(k1, (D, H), dtype=jnp.float32) * (1.0 / jnp.sqrt(D))
    b1 = jax.random.normal(k2, (H,), dtype=jnp.float32) * 0.01
    w2 = jax.random.normal(k3, (H, D), dtype=jnp.float32) * (1.0 / jnp.sqrt(H))
    b2 = jax.random.normal(k4, (D,), dtype=jnp.float32) * 0.01
    gamma = jnp.ones((D,), dtype=jnp.float32)
    beta = jnp.zeros((D,), dtype=jnp.float32)

    # One-time parameter prep (bf16 weights) so per-call wrappers never re-cast.
    pw1, pb1, pw2, pb2, pg, pbe = prepare_ffn_params(w1, b1, w2, b2, gamma, beta)

    def ref_ffn(xx):
        """Pure-JAX reference mirroring the kernel's bf16-operand / f32-accumulate path."""
        xb = xx.astype(jnp.bfloat16)
        h = jnp.dot(xb, w1.astype(jnp.bfloat16), preferred_element_type=jnp.float32) + b1
        h = jnp.maximum(h, 0.0)
        y = jnp.dot(h.astype(jnp.bfloat16), w2.astype(jnp.bfloat16),
                    preferred_element_type=jnp.float32) + b2
        z = xx + y
        mu = jnp.mean(z, axis=-1, keepdims=True)
        var = jnp.mean((z - mu) ** 2, axis=-1, keepdims=True)
        return (z - mu) * jax.lax.rsqrt(var + 1e-5) * gamma + beta

    # 1) Weight-resident fast path (default schedule) with row padding (batch*seq = 14).
    x_odd = x[:, :7, :]
    out1 = jax.block_until_ready(feed_forward_network(x_odd, pw1, pb1, pw2, pb2, pg, pbe))
    assert out1.shape == (2, 7, D)
    assert jnp.allclose(out1, ref_ffn(x_odd), atol=2e-3, rtol=2e-3), "mismatch (resident/padded)"

    # 2) Weight-resident path with multiple row tiles (grid (2, 1)).
    out2 = jax.block_until_ready(feed_forward_network(x, pw1, pb1, pw2, pb2, pg, pbe, tm=8))
    assert out2.shape == (B, S, D)
    assert jnp.allclose(out2, ref_ffn(x), atol=2e-3, rtol=2e-3), "mismatch (resident/multi-tile)"

    # 3) Hidden-dim streamed path (grid (2, 4)) — exercises the accumulator + bf16-x scratch.
    out3 = jax.block_until_ready(feed_forward_network(x, pw1, pb1, pw2, pb2, pg, pbe,
                                                      tm=8, tk=128))
    assert out3.shape == (B, S, D)
    assert jnp.allclose(out3, ref_ffn(x), atol=2e-3, rtol=2e-3), "mismatch (tiled path)"

    print("KERNEL_OK")
</pallas_src>

<mosaic_0001>
module attributes {stable_mosaic.version = 11 : i64} {
  func.func @ffn_kernel_resident(%arg0: i32, %arg1: i32, %arg2: memref<16x128xf32, #tpu.memory_space<vmem>>, %arg3: memref<128x512xbf16, #tpu.memory_space<vmem>>, %arg4: memref<1x512xf32, #tpu.memory_space<vmem>>, %arg5: memref<512x128xbf16, #tpu.memory_space<vmem>>, %arg6: memref<1x128xf32, #tpu.memory_space<vmem>>, %arg7: memref<1x128xf32, #tpu.memory_space<vmem>>, %arg8: memref<1x128xf32, #tpu.memory_space<vmem>>, %arg9: memref<16x128xf32, #tpu.memory_space<vmem>>) attributes {dimension_semantics = [#tpu.dimension_semantics<parallel>, #tpu.dimension_semantics<arbitrary>], iteration_bounds = array<i64: 1, 1>, scalar_prefetch = 0 : i64, scratch_operands = 0 : i64, tpu.core_type = #tpu.core_type<tc>, window_params = [{transform_indices = @transform_0, window_bounds = array<i64: 16, 128>}, {transform_indices = @transform_1, window_bounds = array<i64: 128, 512>}, {transform_indices = @transform_2, window_bounds = array<i64: 1, 512>}, {transform_indices = @transform_3, window_bounds = array<i64: 512, 128>}, {pipeline_mode = #tpu.pipeline_mode<synchronous>, transform_indices = @transform_4, window_bounds = array<i64: 1, 128>}, {pipeline_mode = #tpu.pipeline_mode<synchronous>, transform_indices = @transform_5, window_bounds = array<i64: 1, 128>}, {pipeline_mode = #tpu.pipeline_mode<synchronous>, transform_indices = @transform_6, window_bounds = array<i64: 1, 128>}, {transform_indices = @transform_7, window_bounds = array<i64: 16, 128>}]} {
    %c0 = arith.constant 0 : index
    %c0_0 = arith.constant 0 : index
    %0 = vector.load %arg2[%c0, %c0_0] : memref<16x128xf32, #tpu.memory_space<vmem>>, vector<16x128xf32>
    %1 = arith.truncf %0 : vector<16x128xf32> to vector<16x128xbf16>
    %c0_1 = arith.constant 0 : index
    %c0_2 = arith.constant 0 : index
    %2 = vector.load %arg3[%c0_1, %c0_2] : memref<128x512xbf16, #tpu.memory_space<vmem>>, vector<128x512xbf16>
    %cst = arith.constant dense<0.000000e+00> : vector<16x512xf32>
    %3 = tpu.matmul %1, %2, %cst {dimension_numbers = #tpu.dot_dimension_numbers<[1], [0], [0], [1], [0, 0, 1, 1], [], []>} : vector<16x128xbf16>, vector<128x512xbf16>, vector<16x512xf32> -> vector<16x512xf32>
    %c0_3 = arith.constant 0 : index
    %c0_4 = arith.constant 0 : index
    %4 = vector.load %arg4[%c0_3, %c0_4] : memref<1x512xf32, #tpu.memory_space<vmem>>, vector<1x512xf32>
    %5 = vector.broadcast %4 : vector<1x512xf32> to vector<16x512xf32>
    %6 = arith.addf %3, %5 : vector<16x512xf32>
    %cst_5 = arith.constant 0.000000e+00 : f32
    %7 = vector.broadcast %cst_5 : f32 to vector<16x512xf32>
    %8 = arith.maximumf %6, %7 : vector<16x512xf32>
    %9 = arith.truncf %8 : vector<16x512xf32> to vector<16x512xbf16>
    %c0_6 = arith.constant 0 : index
    %c0_7 = arith.constant 0 : index
    %10 = vector.load %arg5[%c0_6, %c0_7] : memref<512x128xbf16, #tpu.memory_space<vmem>>, vector<512x128xbf16>
    %cst_8 = arith.constant dense<0.000000e+00> : vector<16x128xf32>
    %11 = tpu.matmul %9, %10, %cst_8 {dimension_numbers = #tpu.dot_dimension_numbers<[1], [0], [0], [1], [0, 0, 1, 1], [], []>} : vector<16x512xbf16>, vector<512x128xbf16>, vector<16x128xf32> -> vector<16x128xf32>
    %12 = arith.addf %0, %11 : vector<16x128xf32>
    %c0_9 = arith.constant 0 : index
    %c0_10 = arith.constant 0 : index
    %13 = vector.load %arg6[%c0_9, %c0_10] : memref<1x128xf32, #tpu.memory_space<vmem>>, vector<1x128xf32>
    %14 = vector.broadcast %13 : vector<1x128xf32> to vector<16x128xf32>
    %15 = arith.addf %12, %14 : vector<16x128xf32>
    %cst_11 = arith.constant dense<0.000000e+00> : vector<16xf32>
    %16 = vector.multi_reduction <add>, %15, %cst_11 [1] : vector<16x128xf32> to vector<16xf32>
    %17 = vector.shape_cast %16 : vector<16xf32> to vector<16x1xf32>
    %cst_12 = arith.constant 7.812500e-03 : f32
    %18 = vector.broadcast %cst_12 : f32 to vector<16x1xf32>
    %19 = arith.mulf %17, %18 : vector<16x1xf32>
    %20 = arith.mulf %15, %15 : vector<16x128xf32>
    %cst_13 = arith.constant dense<0.000000e+00> : vector<16xf32>
    %21 = vector.multi_reduction <add>, %20, %cst_13 [1] : vector<16x128xf32> to vector<16xf32>
    %22 = vector.shape_cast %21 : vector<16xf32> to vector<16x1xf32>
    %cst_14 = arith.constant 7.812500e-03 : f32
    %23 = vector.broadcast %cst_14 : f32 to vector<16x1xf32>
    %24 = arith.mulf %22, %23 : vector<16x1xf32>
    %25 = arith.mulf %19, %19 : vector<16x1xf32>
    %26 = arith.subf %24, %25 : vector<16x1xf32>
    %cst_15 = arith.constant 0.000000e+00 : f32
    %27 = vector.broadcast %cst_15 : f32 to vector<16x1xf32>
    %28 = arith.maximumf %26, %27 : vector<16x1xf32>
    %29 = vector.broadcast %19 : vector<16x1xf32> to vector<16x128xf32>
    %30 = arith.subf %15, %29 : vector<16x128xf32>
    %cst_16 = arith.constant 9.99999974E-6 : f32
    %31 = vector.broadcast %cst_16 : f32 to vector<16x1xf32>
    %32 = arith.addf %28, %31 : vector<16x1xf32>
    %33 = math.rsqrt %32 : vector<16x1xf32>
    %34 = vector.broadcast %33 : vector<16x1xf32> to vector<16x128xf32>
    %35 = arith.mulf %30, %34 : vector<16x128xf32>
    %c0_17 = arith.constant 0 : index
    %c0_18 = arith.constant 0 : index
    %36 = vector.load %arg7[%c0_17, %c0_18] : memref<1x128xf32, #tpu.memory_space<vmem>>, vector<1x128xf32>
    %37 = vector.broadcast %36 : vector<1x128xf32> to vector<16x128xf32>
    %38 = arith.mulf %35, %37 : vector<16x128xf32>
    %c0_19 = arith.constant 0 : index
    %c0_20 = arith.constant 0 : index
    %39 = vector.load %arg8[%c0_19, %c0_20] : memref<1x128xf32, #tpu.memory_space<vmem>>, vector<1x128xf32>
    %40 = vector.broadcast %39 : vector<1x128xf32> to vector<16x128xf32>
    %41 = arith.addf %38, %40 : vector<16x128xf32>
    %c0_21 = arith.constant 0 : index
    %c0_22 = arith.constant 0 : index
    %42 = vector.load %arg9[%c0_21, %c0_22] : memref<16x128xf32, #tpu.memory_space<vmem>>, vector<16x128xf32>
    tpu.vector_store %arg9[%c0_21, %c0_22], %41 {strides = array<i32>} : memref<16x128xf32, #tpu.memory_space<vmem>>, vector<16x128xf32>,
    return
  }
  func.func @transform_0(%arg0: i32, %arg1: i32) -> (i32, i32) {
    %c0_i32 = arith.constant 0 : i32
    %c0_i32_0 = arith.constant 0 : i32
    return %arg0, %c0_i32 : i32, i32
  }
  func.func @transform_1(%arg0: i32, %arg1: i32) -> (i32, i32) {
    %c0_i32 = arith.constant 0 : i32
    %c0_i32_0 = arith.constant 0 : i32
    return %c0_i32, %arg1 : i32, i32
  }
  func.func @transform_2(%arg0: i32, %arg1: i32) -> (i32, i32) {
    %c0_i32 = arith.constant 0 : i32
    %c0_i32_0 = arith.constant 0 : i32
    return %c0_i32, %arg1 : i32, i32
  }
  func.func @transform_3(%arg0: i32, %arg1: i32) -> (i32, i32) {
    %c0_i32 = arith.constant 0 : i32
    %c0_i32_0 = arith.constant 0 : i32
    return %arg1, %c0_i32 : i32, i32
  }
  func.func @transform_4(%arg0: i32, %arg1: i32) -> (i32, i32) {
    %c0_i32 = arith.constant 0 : i32
    %c0_i32_0 = arith.constant 0 : i32
    %c0_i32_1 = arith.constant 0 : i32
    return %c0_i32, %c0_i32_0 : i32, i32
  }
  func.func @transform_5(%arg0: i32, %arg1: i32) -> (i32, i32) {
    %c0_i32 = arith.constant 0 : i32
    %c0_i32_0 = arith.constant 0 : i32
    %c0_i32_1 = arith.constant 0 : i32
    return %c0_i32, %c0_i32_0 : i32, i32
  }
  func.func @transform_6(%arg0: i32, %arg1: i32) -> (i32, i32) {
    %c0_i32 = arith.constant 0 : i32
    %c0_i32_0 = arith.constant 0 : i32
    %c0_i32_1 = arith.constant 0 : i32
    return %c0_i32, %c0_i32_0 : i32, i32
  }
  func.func @transform_7(%arg0: i32, %arg1: i32) -> (i32, i32) {
    %c0_i32 = arith.constant 0 : i32
    %c0_i32_0 = arith.constant 0 : i32
    return %arg0, %c0_i32 : i32, i32
  }
}

</mosaic_0001>

<bundles_post_ra>
// kernel: tpu_custom_call.1
= control target key start
LH: loop header
LB: loop body
LE: loop exit
PB: predicated region body
PF: predicated region fallthrough
CT: control target
= control target key end

     0   :  { %12 = vsyncpa [#allocation3], 0  ;;  %s1224_s0 = inlined_call_operand.hbm [shape: f32[16,128], index: 0, kind: input, shape index: {}]   ;;  %s1225_s1 = inlined_call_operand.hbm [shape: bf16[128,512], index: 1, kind: input, shape index: {}]   ;;  %s1226_s2 = inlined_call_operand.vmem [shape: f32[1,512], index: 2, kind: input, shape index: {}]   ;;  %s1227_s3 = inlined_call_operand.hbm [shape: bf16[512,128], index: 3, kind: input, shape index: {}]   ;;  %s1228_s4 = inlined_call_operand.vmem [shape: f32[1,128], index: 4, kind: input, shape index: {}]   ;;  %s1229_s5 = inlined_call_operand.vmem [shape: f32[1,128], index: 5, kind: input, shape index: {}]   ;;  %s1230_s6 = inlined_call_operand.vmem [shape: f32[1,128], index: 6, kind: input, shape index: {}]   ;;  %s1231_s7 = inlined_call_operand.hbm [shape: f32[16,128], index: 7, kind: output, shape index: {}]  }
   0x1   :  { %13 = vsyncpa [#allocation6], 0 }
   0x2   :  { %14 = vsyncpa [#allocation4], 0  ;;  %s1099_s24 = smov [#allocation5]   ;;  %s1005_s28 = scalar_lea.hbm %s1225_s1, 4096 }
   0x3   :  { %s32_s25 = sshll.u32 %s1099_s24, 4  ;;  %p1006_p0 = scmp.ne.s32.totalorder %s1225_s1, %s1005_s28  ;;  %s33_s25 = int_to_ptr.vmem [resolvable:$true] %s32_s25 }
   0x4   :  { %p1009_p1 = scmp.lt.u32.totalorder %s1005_s28, %s1225_s1 }
   0x6   :  { %p1011_p2 = pnand %p1009_p1, %p1006_p0 }
   0x8   :  { %1014 = shalt.err (!%p1011_p2)
}
   0x9   :  { %s1015_s10 = scalar_lea.vmem %s33_s25, 4096  ;;  %p1020_p4 = scmp.lt.s32.totalorder %s33_s25, %s33_s25 }
   0xa   :  { %p1016_p3 = scmp.ne.s32.totalorder %s33_s25, %s1015_s10  ;;  %p1021_p5 = scmp.lt.s32.totalorder %s1015_s10, %s1015_s10 }
   0xc   :  { %p1022_p6 = por %p1021_p5, %p1020_p4 }
   0xe   :  { %p1023_p7 = pnand %p1022_p6, %p1016_p3 }
  0x10   :  { %1026 = shalt.err (!%p1023_p7)
}
  0x11   :  { %s1100_s11 = smov 256   ;;  %s1101_s12 = smov 16  }
  0x12   :  { %38 = dma.hbm_to_vmem [thread:$0]  %s1225_s1, 4096, %s33_s25, [#allocation6], %s1100_s11, %s1100_s11, %s1101_s12  }
  0x13   :  { %s1102_s15 = smov [#allocation2]   ;;  %s1027_s19 = scalar_lea.hbm %s1224_s0, 256 }
  0x14   :  { %s20_s16 = sshll.u32 %s1102_s15, 4  ;;  %p1028_p8 = scmp.ne.s32.totalorder %s1224_s0, %s1027_s19  ;;  %s21_s16 = int_to_ptr.vmem [resolvable:$true] %s20_s16 }
  0x15   :  { %p1031_p9 = scmp.lt.u32.totalorder %s1027_s19, %s1224_s0 }
  0x17   :  { %p1033_p10 = pnand %p1031_p9, %p1028_p8 }
  0x19   :  { %1036 = shalt.err (!%p1033_p10)
}
  0x1a   :  { %s1037_s24 = scalar_lea.vmem %s21_s16, 256  ;;  %p1042_p12 = scmp.lt.s32.totalorder %s21_s16, %s21_s16 }
  0x1b   :  { %p1038_p11 = scmp.ne.s32.totalorder %s21_s16, %s1037_s24  ;;  %p1043_p13 = scmp.lt.s32.totalorder %s1037_s24, %s1037_s24 }
  0x1d   :  { %p1044_p0 = por %p1043_p13, %p1042_p12 }
  0x1f   :  { %p1045_p1 = pnand %p1044_p0, %p1038_p11 }
  0x21   :  { %1048 = shalt.err (!%p1045_p1)
}
  0x22   :  { %s1103_s1 = smov 128   ;;  %s1104_s25 = smov 8  }
  0x23   :  { %26 = dma.hbm_to_vmem [thread:$0]  %s1224_s0, 256, %s21_s16, [#allocation3], %s1103_s1, %s1103_s1, %s1104_s25  }
  0x24   :  { %s1105_s28 = smov [#allocation7]   ;;  %s1049_s9 = scalar_lea.hbm %s1227_s3, 4096 }
  0x25   :  { %s46_s29 = sshll.u32 %s1105_s28, 4  ;;  %p1050_p2 = scmp.ne.s32.totalorder %s1227_s3, %s1049_s9  ;;  %s47_s29 = int_to_ptr.vmem [resolvable:$true] %s46_s29 }
  0x26   :  { %p1053_p3 = scmp.lt.u32.totalorder %s1049_s9, %s1227_s3 }
  0x28   :  { %p1055_p4 = pnand %p1053_p3, %p1050_p2 }
  0x2a   :  { %1058 = shalt.err (!%p1055_p4)
}
  0x2b   :  { %s1059_s14 = scalar_lea.vmem %s47_s29, 4096  ;;  %p1064_p6 = scmp.lt.s32.totalorder %s47_s29, %s47_s29 }
  0x2c   :  { %p1060_p5 = scmp.ne.s32.totalorder %s47_s29, %s1059_s14  ;;  %p1065_p7 = scmp.lt.s32.totalorder %s1059_s14, %s1059_s14 }
  0x2e   :  { %p1066_p8 = por %p1065_p7, %p1064_p6 }
  0x30   :  { %p1067_p9 = pnand %p1066_p8, %p1060_p5 }
  0x32   :  { %1070 = shalt.err (!%p1067_p9)
}
  0x33   :  { %s1106_s0 = smov 64   ;;  %s1107_s15 = smov 4  }
  0x34   :  { %52 = dma.hbm_to_vmem [thread:$0]  %s1227_s3, 4096, %s47_s29, [#allocation6], %s1106_s0, %s1106_s0, %s1107_s15  }
  0x35   :  { %1093 = dma.done.wait [#allocation3], 256  }
  0x36   :  { %1094 = vsyncadd [#allocation3], 4294967040 }
  0x37   :  { %1095 = dma.done.wait [#allocation6], 8192  }
  0x38   :  { %1096 = vsyncadd [#allocation6], 4294959104  ;;  %v1108_v0 = vmov 0   ;;  %v921_v1 = vld [vmem:[#allocation5 + $0x4] ss:$16 sps:$4 sm:$0xff]   ;;  %v1191_v34 = vld [vmem:[#allocation2 + $0x8] sm:$0xff] }
  0x39   :  { %318 = vmatprep.mubr.bf16.mxu0 %v1108_v0  ;;  %361 = vmatprep.mubr.bf16.mxu1 %v1108_v0  ;;  %v923_v2 = vld [vmem:[#allocation5 + $0xc] ss:$16 sps:$4 sm:$0xff]   ;;  %v925_v3 = vld [vmem:[#allocation5] ss:$16 sps:$4 sm:$0xff]   ;;  %v926_v4 = vld [vmem:[#allocation5 + $0x8] ss:$16 sps:$4 sm:$0xff]  }
  0x3a   :  { %286 = vmatprep.subr.bf16.mxu0 %v921_v1  ;;  %329 = vmatprep.subr.bf16.mxu1 %v923_v2  ;;  %v927_v5 = vld [vmem:[#allocation5 + $0x24] ss:$16 sps:$4 sm:$0xff]   ;;  %v929_v6 = vld [vmem:[#allocation5 + $0x2c] ss:$16 sps:$4 sm:$0xff]   ;;  %v931_v7 = vld [vmem:[#allocation5 + $0x20] ss:$16 sps:$4 sm:$0xff]  }
  0x3b   :  { %287 = vmatpush1.bf16.msra.mxu0 %v925_v3  ;;  %330 = vmatpush1.bf16.msra.mxu1 %v926_v4  ;;  %v932_v8 = vld [vmem:[#allocation5 + $0x28] ss:$16 sps:$4 sm:$0xff]   ;;  %v933_v9 = vld [vmem:[#allocation5 + $0x44] ss:$16 sps:$4 sm:$0xff]   ;;  %v935_v10 = vld [vmem:[#allocation5 + $0x4c] ss:$16 sps:$4 sm:$0xff]   ;;  %v106_v4 = vlaneseq }
  0x3c   :  { %288 = vmatprep.subr.bf16.mxu0 %v927_v5  ;;  %331 = vmatprep.subr.bf16.mxu1 %v929_v6  ;;  %v937_v11 = vld [vmem:[#allocation5 + $0x40] ss:$16 sps:$4 sm:$0xff]   ;;  %v938_v12 = vld [vmem:[#allocation5 + $0x48] ss:$16 sps:$4 sm:$0xff]   ;;  %v939_v13 = vld [vmem:[#allocation5 + $0x64] ss:$16 sps:$4 sm:$0xff]  }
  0x3d   :  { %v941_v14 = vld [vmem:[#allocation5 + $0x6c] ss:$16 sps:$4 sm:$0xff]   ;;  %v943_v15 = vld [vmem:[#allocation5 + $0x60] ss:$16 sps:$4 sm:$0xff]   ;;  %v944_v16 = vld [vmem:[#allocation5 + $0x68] ss:$16 sps:$4 sm:$0xff]  }
  0x3e   :  { %v945_v17 = vld [vmem:[#allocation5 + $0x84] ss:$16 sps:$4 sm:$0xff]   ;;  %v947_v18 = vld [vmem:[#allocation5 + $0x8c] ss:$16 sps:$4 sm:$0xff]   ;;  %v949_v19 = vld [vmem:[#allocation5 + $0x80] ss:$16 sps:$4 sm:$0xff]  }
  0x3f   :  { %289 = vmatpush1.bf16.msra.mxu0 %v931_v7  ;;  %332 = vmatpush1.bf16.msra.mxu1 %v932_v8  ;;  %v950_v20 = vld [vmem:[#allocation5 + $0x88] ss:$16 sps:$4 sm:$0xff]   ;;  %v951_v21 = vld [vmem:[#allocation5 + $0xa4] ss:$16 sps:$4 sm:$0xff]   ;;  %v953_v22 = vld [vmem:[#allocation5 + $0xac] ss:$16 sps:$4 sm:$0xff]  }
  0x40   :  { %290 = vmatprep.subr.bf16.mxu0 %v933_v9  ;;  %333 = vmatprep.subr.bf16.mxu1 %v935_v10  ;;  %v955_v23 = vld [vmem:[#allocation5 + $0xa0] ss:$16 sps:$4 sm:$0xff]   ;;  %v956_v24 = vld [vmem:[#allocation5 + $0xa8] ss:$16 sps:$4 sm:$0xff]   ;;  %v957_v25 = vld [vmem:[#allocation5 + $0xc4] ss:$16 sps:$4 sm:$0xff]  }
  0x41   :  { %v959_v26 = vld [vmem:[#allocation5 + $0xcc] ss:$16 sps:$4 sm:$0xff]   ;;  %v961_v27 = vld [vmem:[#allocation5 + $0xc0] ss:$16 sps:$4 sm:$0xff]   ;;  %v962_v28 = vld [vmem:[#allocation5 + $0xc8] ss:$16 sps:$4 sm:$0xff]  }
  0x42   :  { %v963_v29 = vld [vmem:[#allocation5 + $0xe4] ss:$16 sps:$4 sm:$0xff]   ;;  %v965_v30 = vld [vmem:[#allocation5 + $0xec] ss:$16 sps:$4 sm:$0xff]   ;;  %v967_v31 = vld [vmem:[#allocation5 + $0xe0] ss:$16 sps:$4 sm:$0xff]  }
  0x43   :  { %291 = vmatpush1.bf16.msra.mxu0 %v937_v11  ;;  %334 = vmatpush1.bf16.msra.mxu1 %v938_v12  ;;  %v968_v32 = vld [vmem:[#allocation5 + $0xe8] ss:$16 sps:$4 sm:$0xff]   ;;  %v1189_v33 = vld [vmem:[#allocation2] sm:$0xff]  ;;  %v969_v35 = vld [vmem:[#allocation7 + $0x40] sm:$0xff]   ;;  %v107_v5 = vshrl.u32 %v106_v4, 7  ;;  %s1109_s23 = smov [#allocation8]  }
  0x44   :  { %292 = vmatprep.subr.bf16.mxu0 %v939_v13  ;;  %335 = vmatprep.subr.bf16.mxu1 %v941_v14  ;;  %v970_v36 = vld [vmem:[#allocation7 + $0xc0] sm:$0xff]   ;;  %v71_v38 = vpack.c.bf16 %v1191_v34, %v1189_v33  ;;  %v973_v40 = vld [vmem:[#allocation7 + $0x48] sm:$0xff]   ;;  %v977_v44 = vld [vmem:[#allocation7 + $0x50] sm:$0xff]   ;;  %s786_s24 = sshll.u32 %s1109_s23, 4  ;;  %s787_s24 = int_to_ptr.vmem [resolvable:$true] %s786_s24 }
  0x45   :  { %v971_v37 = vld [vmem:[#allocation7] sm:$0xff]   ;;  %v974_v41 = vld [vmem:[#allocation7 + $0xc8] sm:$0xff]   ;;  %v978_v45 = vld [vmem:[#allocation7 + $0xd0] sm:$0xff]   ;;  %v108_v6 = vsub.s32 0, %v107_v5  ;;  %v116_v7 = vsub.s32 2, %v107_v5  ;;  %v112_v9 = vsub.s32 1, %v107_v5  ;;  %p1076_p11 = scmp.lt.s32.totalorder %s787_s24, %s787_s24 }
  0x46   :  { %v972_v39 = vld [vmem:[#allocation7 + $0x80] sm:$0xff]   ;;  %v975_v42 = vld [vmem:[#allocation7 + $0x8] sm:$0xff]   ;;  %v979_v46 = vld [vmem:[#allocation7 + $0x10] sm:$0xff]   ;;  %v120_v10 = vsub.s32 3, %v107_v5  ;;  %s1071_s26 = scalar_lea.vmem %s787_s24, 256 }
  0x47   :  { %293 = vmatpush1.bf16.msra.mxu0 %v943_v15  ;;  %336 = vmatpush1.bf16.msra.mxu1 %v944_v16  ;;  %v976_v43 = vld [vmem:[#allocation7 + $0x88] sm:$0xff]   ;;  %v980_v47 = vld [vmem:[#allocation7 + $0x90] sm:$0xff]   ;;  %v981_v48 = vld [vmem:[#allocation7 + $0x58] sm:$0xff]   ;;  %p1072_p10 = scmp.ne.s32.totalorder %s787_s24, %s1071_s26  ;;  %p1077_p12 = scmp.lt.s32.totalorder %s1071_s26, %s1071_s26 }
  0x48   :  { %294 = vmatprep.subr.bf16.mxu0 %v945_v17  ;;  %337 = vmatprep.subr.bf16.mxu1 %v947_v18  ;;  %v982_v49 = vld [vmem:[#allocation7 + $0xd8] sm:$0xff]   ;;  %v985_v52 = vld [vmem:[#allocation7 + $0x60] sm:$0xff]   ;;  %v989_v56 = vld [vmem:[#allocation7 + $0x68] sm:$0xff]  }
  0x49   :  { %v983_v50 = vld [vmem:[#allocation7 + $0x18] sm:$0xff]   ;;  %v986_v53 = vld [vmem:[#allocation7 + $0xe0] sm:$0xff]   ;;  %v990_v57 = vld [vmem:[#allocation7 + $0xe8] sm:$0xff]   ;;  %p1078_p13 = por %p1077_p12, %p1076_p11 }
  0x4a   :  { %v984_v51 = vld [vmem:[#allocation7 + $0x98] sm:$0xff]   ;;  %v987_v54 = vld [vmem:[#allocation7 + $0x20] sm:$0xff]   ;;  %v991_v58 = vld [vmem:[#allocation7 + $0x28] sm:$0xff]  }
  0x4b   :  { %295 = vmatpush1.bf16.msra.mxu0 %v949_v19  ;;  %338 = vmatpush1.bf16.msra.mxu1 %v950_v20  ;;  %v988_v55 = vld [vmem:[#allocation7 + $0xa0] sm:$0xff]   ;;  %v992_v59 = vld [vmem:[#allocation7 + $0xa8] sm:$0xff]   ;;  %v993_v60 = vld [vmem:[#allocation7 + $0x70] sm:$0xff]   ;;  %p1079_p0 = pnand %p1078_p13, %p1072_p10 }
  0x4c   :  { %296 = vmatprep.subr.bf16.mxu0 %v951_v21  ;;  %339 = vmatprep.subr.bf16.mxu1 %v953_v22  ;;  %v994_v61 = vld [vmem:[#allocation7 + $0xf0] sm:$0xff]   ;;  %v997_v0 = vld [vmem:[#allocation7 + $0x78] sm:$0xff]  }
  0x4d   :  { %v995_v62 = vld [vmem:[#allocation7 + $0x30] sm:$0xff]   ;;  %v998_v1 = vld [vmem:[#allocation7 + $0xf8] sm:$0xff]  }
  0x4e   :  { %v996_v63 = vld [vmem:[#allocation7 + $0xb0] sm:$0xff]   ;;  %v999_v2 = vld [vmem:[#allocation7 + $0x38] sm:$0xff]  }
  0x4f   :  { %297 = vmatpush1.bf16.msra.mxu0 %v955_v23  ;;  %340 = vmatpush1.bf16.msra.mxu1 %v956_v24  ;;  %v1000_v3 = vld [vmem:[#allocation7 + $0xb8] sm:$0xff]   ;;  %v104_v8 = vld [vmem:[%s1226_s2] sm:$0xf] }
  0x50   :  { %298 = vmatprep.subr.bf16.mxu0 %v957_v25  ;;  %341 = vmatprep.subr.bf16.mxu1 %v959_v26  ;;  %v109_v11 = vrot.slane %v104_v8, %v108_v6  ;;  %v117_v12 = vrot.slane %v104_v8, %v116_v7  ;;  %v113_v13 = vrot.slane %v104_v8, %v112_v9 }
  0x51   :  { %v121_v14 = vrot.slane %v104_v8, %v120_v10 }
  0x53   :  { %299 = vmatpush1.bf16.msra.mxu0 %v961_v27  ;;  %342 = vmatpush1.bf16.msra.mxu1 %v962_v28 }
  0x54   :  { %300 = vmatprep.subr.bf16.mxu0 %v963_v29  ;;  %343 = vmatprep.subr.bf16.mxu1 %v965_v30 }
  0x57   :  { %301 = vmatpush1.bf16.msra.mxu0 %v967_v31  ;;  %344 = vmatpush1.bf16.msra.mxu1 %v968_v32 }
  0x58   :  { %866 = vmatprep.subr.bf16.mxu0 %v969_v35  ;;  %888 = vmatprep.subr.bf16.mxu1 %v970_v36 }
  0x5a   :  { %319 = vmatmul.mubr.bf16.vlgmr.msra.gmra.mrb[0].mxu0 %v71_v38  ;;  %362 = vmatmul.mubr.bf16.vlgmr.msra.gmra.mrb[0].mxu1 %v71_v38 }
  0x5b   :  { %867 = vmatpush3.bf16.msra.mxu0 %v971_v37  ;;  %889 = vmatpush3.bf16.msra.mxu1 %v972_v39 }
  0x5c   :  { %868 = vmatprep.subr.bf16.mxu0 %v973_v40  ;;  %890 = vmatprep.subr.bf16.mxu1 %v974_v41 }
  0x5f   :  { %869 = vmatpush3.bf16.msra.mxu0 %v975_v42  ;;  %891 = vmatpush3.bf16.msra.mxu1 %v976_v43 }
  0x60   :  { %870 = vmatprep.subr.bf16.mxu0 %v977_v44  ;;  %892 = vmatprep.subr.bf16.mxu1 %v978_v45 }
  0x63   :  { %871 = vmatpush3.bf16.msra.mxu0 %v979_v46  ;;  %893 = vmatpush3.bf16.msra.mxu1 %v980_v47 }
  0x64   :  { %872 = vmatprep.subr.bf16.mxu0 %v981_v48  ;;  %894 = vmatprep.subr.bf16.mxu1 %v982_v49 }
  0x67   :  { %873 = vmatpush3.bf16.msra.mxu0 %v983_v50  ;;  %895 = vmatpush3.bf16.msra.mxu1 %v984_v51 }
  0x68   :  { %874 = vmatprep.subr.bf16.mxu0 %v985_v52  ;;  %896 = vmatprep.subr.bf16.mxu1 %v986_v53 }
  0x6b   :  { %875 = vmatpush3.bf16.msra.mxu0 %v987_v54  ;;  %897 = vmatpush3.bf16.msra.mxu1 %v988_v55 }
  0x6c   :  { %876 = vmatprep.subr.bf16.mxu0 %v989_v56  ;;  %898 = vmatprep.subr.bf16.mxu1 %v990_v57 }
  0x6f   :  { %877 = vmatpush3.bf16.msra.mxu0 %v991_v58  ;;  %899 = vmatpush3.bf16.msra.mxu1 %v992_v59  ;;  %v863_v58 = vld [vmem:[%s1228_s4] ss:$0 sm:$0xff] }
  0x70   :  { %878 = vmatprep.subr.bf16.mxu0 %v993_v60  ;;  %900 = vmatprep.subr.bf16.mxu1 %v994_v61 }
  0x73   :  { %879 = vmatpush3.bf16.msra.mxu0 %v995_v62  ;;  %901 = vmatpush3.bf16.msra.mxu1 %v996_v63 }
  0x74   :  { %880 = vmatprep.subr.bf16.mxu0 %v997_v0  ;;  %902 = vmatprep.subr.bf16.mxu1 %v998_v1 }
  0x77   :  { %881 = vmatpush3.bf16.msra.mxu0 %v999_v2  ;;  %903 = vmatpush3.bf16.msra.mxu1 %v1000_v3 }
 0x12d   :  { %v320_v15 = vpop.f32.mrb[0].mxu0  ;;  %v363_v16 = vpop.f32.mrb[0].mxu1 }
 0x12e   :  { %v321_v17 = vadd.f32 %v320_v15, %v109_v11  ;;  %v364_v18 = vadd.f32 %v363_v16, %v117_v12  ;;  %v322_v19 = vpop.f32.mrb[1].mxu0  ;;  %v365_v20 = vpop.f32.mrb[1].mxu1 }
 0x12f   :  { %v323_v21 = vadd.f32 %v322_v19, %v113_v13  ;;  %v366_v22 = vadd.f32 %v365_v20, %v121_v14  ;;  %v324_v23 = vpop.f32.mrb[2].mxu0  ;;  %v367_v24 = vpop.f32.mrb[2].mxu1  ;;  %v865_v20 = vld [vmem:[%s1230_s6] ss:$0 sm:$0xff] }
 0x130   :  { %v325_v25 = vadd.f32 %v324_v23, %v109_v11  ;;  %v368_v26 = vadd.f32 %v367_v24, %v117_v12  ;;  %v326_v27 = vpop.f32.mrb[3].mxu0  ;;  %v369_v28 = vpop.f32.mrb[3].mxu1  ;;  %v372_v31 = vmax.f32 %v321_v17, 0.0  ;;  %v374_v32 = vmax.f32 %v364_v18, 0.0  ;;  %v864_v18 = vld [vmem:[%s1229_s5] ss:$0 sm:$0xff] }
 0x131   :  { %v327_v29 = vadd.f32 %v326_v27, %v113_v13  ;;  %v370_v30 = vadd.f32 %v369_v28, %v121_v14  ;;  %v373_v37 = vmax.f32 %v323_v21, 0.0  ;;  %v375_v38 = vmax.f32 %v366_v22, 0.0 }
 0x132   :  { %v376_v35 = vmax.f32 %v325_v25, 0.0  ;;  %v378_v36 = vmax.f32 %v368_v26, 0.0 }
 0x133   :  { %v377_v39 = vmax.f32 %v327_v29, 0.0  ;;  %v379_v40 = vmax.f32 %v370_v30, 0.0 }
 0x134   :  { %v380_v41 = vpack.c.bf16 %v376_v35, %v372_v31  ;;  %v382_v42 = vpack.c.bf16 %v378_v36, %v374_v32 }
 0x135   :  { %v381_v43 = vpack.c.bf16 %v377_v39, %v373_v37  ;;  %v383_v44 = vpack.c.bf16 %v379_v40, %v375_v38 }
 0x137   :  { %672 = vmatprep.mubr.bf16.mxu0 %v381_v43  ;;  %713 = vmatprep.mubr.bf16.mxu1 %v383_v44 }
 0x138   :  { %673 = vmatmul.mubr.bf16.vlgmr.msra.gmra.mrb[4].mxu0 %v380_v41  ;;  %714 = vmatmul.mubr.bf16.vlgmr.msra.gmra.mrb[4].mxu1 %v382_v42 }
 0x20b   :  { %v882_v45 = vpop.f32.mrb[4].mxu0  ;;  %v904_v46 = vpop.f32.mrb[4].mxu1 }
 0x20c   :  { %v883_v47 = vpop.f32.mrb[5].mxu0  ;;  %v905_v48 = vpop.f32.mrb[5].mxu1 }
 0x20d   :  { %v884_v49 = vadd.f32 %v883_v47, %v882_v45  ;;  %v906_v50 = vadd.f32 %v905_v48, %v904_v46  ;;  %v885_v51 = vpop.f32.mrb[6].mxu0  ;;  %v907_v52 = vpop.f32.mrb[6].mxu1 }
 0x20e   :  { %v886_v53 = vpop.f32.mrb[7].mxu0  ;;  %v908_v54 = vpop.f32.mrb[7].mxu1 }
 0x20f   :  { %v716_v55 = vadd.f32 %v906_v50, %v884_v49  ;;  %v887_v56 = vadd.f32 %v886_v53, %v885_v51  ;;  %v909_v57 = vadd.f32 %v908_v54, %v907_v52 }
 0x211   :  { %v722_v59 = vadd.f32 %v716_v55, %v1189_v33  ;;  %v719_v60 = vadd.f32 %v909_v57, %v887_v56 }
 0x213   :  { %v723_v61 = vadd.f32 %v719_v60, %v1191_v34  ;;  %v731_v62 = vadd.f32 %v863_v58, %v722_v59 }
 0x215   :  { %733 = vadd.xlane.f32.xlu0 %v731_v62  ;;  %v739_v63 = vmul.f32 %v731_v62, %v731_v62  ;;  %v732_v0 = vadd.f32 %v863_v58, %v723_v61 }
 0x217   :  { %741 = vadd.xlane.f32.xlu1 %v739_v63  ;;  %v740_v1 = vmul.f32 %v732_v0, %v732_v0 }
 0x219   :  { %735 = vadd.xlane.f32.xlu0 %v732_v0 }
 0x21b   :  { %743 = vadd.xlane.f32.xlu1 %v740_v1 }
 0x2a2   :  { %v734_v2 = vpop.xlane.xlu0 %733 }
 0x2a3   :  { %v737_v3 = vmul.f32 0.0078125, %v734_v2 }
 0x2a4   :  { %v742_v4 = vpop.xlane.xlu1 %741 }
 0x2a5   :  { %v747_v5 = vmul.f32 %v737_v3, %v737_v3  ;;  %v745_v6 = vmul.f32 0.0078125, %v742_v4  ;;  %v753_v16 = vsub.f32 %v731_v62, %v737_v3 }
 0x2a6   :  { %v736_v7 = vpop.xlane.xlu0 %735 }
 0x2a7   :  { %v749_v8 = vsub.f32 %v745_v6, %v747_v5  ;;  %v738_v9 = vmul.f32 0.0078125, %v736_v7 }
 0x2a8   :  { %v744_v33 = vpop.xlane.xlu1 %743 }
 0x2a9   :  { %v751_v10 = vmax.f32 %v749_v8, 0.0  ;;  %v748_v11 = vmul.f32 %v738_v9, %v738_v9  ;;  %v746_v34 = vmul.f32 0.0078125, %v744_v33  ;;  %v754_v21 = vsub.f32 %v732_v0, %v738_v9 }
 0x2ab   :  { %v755_v12 = vadd.f32 1e-05, %v751_v10  ;;  %v750_v13 = vsub.f32 %v746_v34, %v748_v11 }
 0x2ad   :  { %1001 = vrsqrt.f32 %v755_v12  ;;  %v752_v14 = vmax.f32 %v750_v13, 0.0 }
 0x2af   :  { %v756_v15 = vadd.f32 1e-05, %v752_v14 }
 0x2b1   :  { %1003 = vrsqrt.f32 %v756_v15 }
 0x2b7   :  { %v1002_v17 = vpop.eup %1001 }
 0x2b8   :  { %v759_v19 = vmul.f32 %v1002_v17, %v753_v16 }
 0x2ba   :  { %v768_v22 = vmul.f32 %v864_v18, %v759_v19 }
 0x2bb   :  { %v1004_v23 = vpop.eup %1003 }
 0x2bc   :  { %v760_v24 = vmul.f32 %v1004_v23, %v754_v21  ;;  %v777_v25 = vadd.f32 %v865_v20, %v768_v22 }
 0x2be   :  { %v769_v26 = vmul.f32 %v864_v18, %v760_v24  ;;  %779 = vst [vmem:[#allocation8] sm:$0xff] %v777_v25 }
 0x2c0   :  { %v778_v27 = vadd.f32 %v865_v20, %v769_v26 }
 0x2c2   :  { %780 = vst [vmem:[#allocation8 + $0x8] sm:$0xff] %v778_v27 }
 0x2c3   :  { %1082 = shalt.err (!%p1079_p0)
}
 0x2c4   :  { %s1083_s27 = scalar_lea.hbm %s1231_s7, 256 }
 0x2c5   :  { %p1084_p1 = scmp.ne.s32.totalorder %s1231_s7, %s1083_s27  ;;  %p1087_p2 = scmp.lt.u32.totalorder %s1083_s27, %s1231_s7 }
 0x2c7   :  { %p1089_p3 = pnand %p1087_p2, %p1084_p1 }
 0x2c9   :  { %1092 = shalt.err (!%p1089_p3)
}
 0x2ca   :  { %792 = dma.vmem_to_hbm [thread:$0]  %s787_s24, 256, %s1231_s7, [#allocation4], %s1103_s1, %s1103_s1, %s1104_s25  }
 0x2cb   :  { %1097 = dma.done.wait [#allocation4], 256  }
 0x2cc   :  { %1098 = vsyncadd [#allocation4], 4294967040 }
 0x2cd   :  { %796 = vsyncpa [#allocation3], 1 }
 0x2ce   :  { %797 = vsyncpa [#allocation6], 1 }
 0x2cf   :  { %798 = vsyncpa [#allocation4], 1 }

</bundles_post_ra>
